<compile_context>
chip_gen: v6e
topology: v6e:2x2x1
jax: 0.10.0
libtpu: 0.0.40
codegen_flags: <defaults>
</compile_context>

<pallas_src>
import functools

import jax
import jax.numpy as jnp
from jax import lax
from jax.experimental import pallas as pl
from jax.experimental.pallas import tpu as pltpu

_EPS = 1e-6
_ACC_ROWS = 8                       # sublane height of per-core accumulators
_DEFAULT_BLOCK_ELEMS = 256 * 1024   # ~1 MiB (f32) per stream per grid step


def _round_up(x, m):
    return (x + m - 1) // m * m


def _sublane_multiple(*dtypes):
    """Minimum row-tile multiple given dtype sublane packing (8/16/32)."""
    m = 8
    for dt in dtypes:
        m = max(m, 8 * max(1, 4 // jnp.dtype(dt).itemsize))
    return m


def _make_dice_kernel(*, tile_r, steps_per_core, n_rows, width,
                      has_mask, has_weights, needs_row_mask):
    r8 = tile_r // _ACC_ROWS
    n_in = 2 + int(has_mask) + int(has_weights)

    def kernel(*refs):
        ins = refs[:n_in]
        inter_ref, psum_ref, gsum_ref = refs[n_in:]
        c = pl.program_id(0)   # core split (parallel)
        i = pl.program_id(1)   # row-tile step within this core (arbitrary)

        if needs_row_mask:
            # Logical (unclamped) block index: rows beyond n_rows (ragged tail
            # or core-1 overshoot of the clamped index_map) must not count.
            blk = c * steps_per_core + i
            rows = blk * tile_r + lax.broadcasted_iota(
                jnp.int32, (tile_r, width), 0)
            valid = rows < n_rows

        def load(ref):
            v = ref[...].astype(jnp.float32)
            if needs_row_mask:
                v = jnp.where(valid, v, 0.0)   # select: safe vs garbage/NaN
            return v

        p = load(ins[0])
        g = load(ins[1])
        mw = None
        nxt = 2
        if has_mask:
            mw = load(ins[nxt])
            nxt += 1
        if has_weights:
            wgt = load(ins[nxt])
            mw = wgt if mw is None else mw * wgt

        pm = p if mw is None else p * mw
        gm = g if mw is None else g * mw
        it = pm * g

        def fold(x):
            # (tile_r, W) -> (8, W) partial sums via row-group adds (VPU only);
            # the cross-lane reduce is deferred to the JAX epilogue.
            return x.reshape(r8, _ACC_ROWS, width).sum(axis=0)

        @pl.when(i == 0)
        def _():
            inter_ref[...] = jnp.zeros_like(inter_ref)
            psum_ref[...] = jnp.zeros_like(psum_ref)
            gsum_ref[...] = jnp.zeros_like(gsum_ref)

        inter_ref[...] += fold(it)
        psum_ref[...] += fold(pm)
        gsum_ref[...] += fold(gm)

    return kernel


def _dice_sums(pred, gt, mask, weights, block_elems):
    width = pred.shape[-1]
    p2 = pred.reshape(-1, width)     # (N*C*H, W): free reshape, no copy
    g2 = gt.reshape(-1, width)
    streams = [p2, g2]
    has_mask = mask is not None
    has_weights = weights is not None
    if has_mask:
        streams.append(mask.reshape(-1, width))
    if has_weights:
        streams.append(weights.reshape(-1, width))

    n_rows = p2.shape[0]
    sub = _sublane_multiple(*[s.dtype for s in streams])
    tile_r = max(sub, (block_elems // max(width, 1)) // sub * sub)
    tile_r = min(tile_r, _round_up(n_rows, sub))

    total_steps = pl.cdiv(n_rows, tile_r)
    n_split = 2 if total_steps >= 2 else 1     # use both TensorCores on v7x
    steps_per_core = pl.cdiv(total_steps, n_split)
    needs_row_mask = (n_split * steps_per_core * tile_r) != n_rows

    def in_map(c, i):
        # Clamp so core-1 overshoot steps re-read a valid block (their
        # contribution is zeroed by the in-kernel row mask).
        return (jnp.minimum(c * steps_per_core + i, total_steps - 1), 0)

    in_spec = pl.BlockSpec((tile_r, width), in_map)
    out_spec = pl.BlockSpec((_ACC_ROWS, width), lambda c, i: (c, 0))
    out_shape = jax.ShapeDtypeStruct((n_split * _ACC_ROWS, width), jnp.float32)

    kernel = _make_dice_kernel(
        tile_r=tile_r, steps_per_core=steps_per_core, n_rows=n_rows,
        width=width, has_mask=has_mask, has_weights=has_weights,
        needs_row_mask=needs_row_mask)

    inter, psum, gsum = pl.pallas_call(
        kernel,
        grid=(n_split, steps_per_core),
        in_specs=[in_spec] * len(streams),
        out_specs=(out_spec, out_spec, out_spec),
        out_shape=(out_shape, out_shape, out_shape),
        compiler_params=pltpu.CompilerParams(
            dimension_semantics=("parallel", "arbitrary")),
    )(*streams)

    return jnp.sum(inter), jnp.sum(psum), jnp.sum(gsum)


@functools.partial(jax.jit, static_argnames=("eps", "block_elems"))
def dice_loss(pred, gt, mask=None, weights=None, eps=_EPS,
              block_elems=_DEFAULT_BLOCK_ELEMS):
    """Pallas DiceLoss: 1 - 2*sum(p*g*m) / (sum(p*m) + sum(g*m) + eps).

    pred, gt: (N, 1, H, W); mask / weights: same shape or None.
    """
    assert pred.ndim == 4, pred.ndim
    assert pred.shape == gt.shape
    if mask is not None:
        assert pred.shape == mask.shape, (pred.shape, mask.shape)
    if weights is not None:
        ref_shape = mask.shape if mask is not None else gt.shape
        assert weights.shape == ref_shape

    inter, psum, gsum = _dice_sums(pred, gt, mask, weights, block_elems)
    union = psum + gsum + jnp.float32(eps)
    return 1.0 - 2.0 * inter / union


def _dice_loss_ref(pred, gt, mask=None, weights=None, eps=_EPS):
    p = pred.astype(jnp.float32)
    g = gt.astype(jnp.float32)
    m = jnp.ones_like(g) if mask is None else mask.astype(jnp.float32)
    if weights is not None:
        m = m * weights.astype(jnp.float32)
    inter = jnp.sum(p * g * m)
    union = jnp.sum(p * m) + jnp.sum(g * m) + eps
    return 1.0 - 2.0 * inter / union


if __name__ == "__main__":
    key = jax.random.PRNGKey(0)
    k1, k2, k3, k4 = jax.random.split(key, 4)

    N, C, H, W = 2, 1, 16, 16
    pred = jax.nn.sigmoid(jax.random.normal(k1, (N, C, H, W), jnp.float32))
    gt = (jax.random.uniform(k2, (N, C, H, W)) > 0.5).astype(jnp.float32)
    mask = (jax.random.uniform(k3, (N, C, H, W)) > 0.1).astype(jnp.float32)
    weights = jax.random.uniform(k4, (N, C, H, W), jnp.float32) + 0.5

    # 4-stream path (mask + weights).
    loss = dice_loss(pred, gt, mask, weights)
    jax.block_until_ready(loss)
    ref = _dice_loss_ref(pred, gt, mask, weights)
    assert jnp.allclose(loss, ref, atol=1e-5, rtol=1e-5), (loss, ref)
    assert float(loss) <= 1.0

    # 2-stream specialization (mask=None, weights=None).
    loss2 = dice_loss(pred, gt)
    jax.block_until_ready(loss2)
    ref2 = _dice_loss_ref(pred, gt)
    assert jnp.allclose(loss2, ref2, atol=1e-5, rtol=1e-5), (loss2, ref2)

    # 3-stream specialization (mask only).
    loss3 = dice_loss(pred, gt, mask)
    jax.block_until_ready(loss3)
    ref3 = _dice_loss_ref(pred, gt, mask)
    assert jnp.allclose(loss3, ref3, atol=1e-5, rtol=1e-5), (loss3, ref3)

    # Multi-step grid with a ragged tail + odd step count (exercises the
    # clamped index_map and in-kernel row mask) via a small block size.
    N2, H2, W2 = 2, 75, 64
    p_b = jax.nn.sigmoid(jax.random.normal(k1, (N2, 1, H2, W2), jnp.float32))
    g_b = (jax.random.uniform(k2, (N2, 1, H2, W2)) > 0.5).astype(jnp.float32)
    m_b = (jax.random.uniform(k3, (N2, 1, H2, W2)) > 0.1).astype(jnp.float32)
    loss4 = dice_loss(p_b, g_b, m_b, None, block_elems=2048)
    jax.block_until_ready(loss4)
    ref4 = _dice_loss_ref(p_b, g_b, m_b, None)
    assert jnp.allclose(loss4, ref4, atol=1e-5, rtol=1e-5), (loss4, ref4)

    print("KERNEL_OK")
</pallas_src>

<mosaic_0001>
module attributes {stable_mosaic.version = 11 : i64} {
  func.func @kernel(%arg0: i32, %arg1: i32, %arg2: memref<32x16xf32, #tpu.memory_space<vmem>>, %arg3: memref<32x16xf32, #tpu.memory_space<vmem>>, %arg4: memref<32x16xf32, #tpu.memory_space<vmem>>, %arg5: memref<32x16xf32, #tpu.memory_space<vmem>>, %arg6: memref<8x16xf32, #tpu.memory_space<vmem>>, %arg7: memref<8x16xf32, #tpu.memory_space<vmem>>, %arg8: memref<8x16xf32, #tpu.memory_space<vmem>>) attributes {dimension_semantics = [#tpu.dimension_semantics<parallel>, #tpu.dimension_semantics<arbitrary>], iteration_bounds = array<i64: 1, 1>, scalar_prefetch = 0 : i64, scratch_operands = 0 : i64, tpu.core_type = #tpu.core_type<tc>, window_params = [{transform_indices = @transform_0, window_bounds = array<i64: 32, 16>}, {transform_indices = @transform_1, window_bounds = array<i64: 32, 16>}, {transform_indices = @transform_2, window_bounds = array<i64: 32, 16>}, {transform_indices = @transform_3, window_bounds = array<i64: 32, 16>}, {transform_indices = @transform_4, window_bounds = array<i64: 8, 16>}, {transform_indices = @transform_5, window_bounds = array<i64: 8, 16>}, {transform_indices = @transform_6, window_bounds = array<i64: 8, 16>}]} {
    %c0 = arith.constant 0 : index
    %c0_0 = arith.constant 0 : index
    %0 = vector.load %arg2[%c0, %c0_0] : memref<32x16xf32, #tpu.memory_space<vmem>>, vector<32x16xf32>
    %c0_1 = arith.constant 0 : index
    %c0_2 = arith.constant 0 : index
    %1 = vector.load %arg3[%c0_1, %c0_2] : memref<32x16xf32, #tpu.memory_space<vmem>>, vector<32x16xf32>
    %c0_3 = arith.constant 0 : index
    %c0_4 = arith.constant 0 : index
    %2 = vector.load %arg4[%c0_3, %c0_4] : memref<32x16xf32, #tpu.memory_space<vmem>>, vector<32x16xf32>
    %c0_5 = arith.constant 0 : index
    %c0_6 = arith.constant 0 : index
    %3 = vector.load %arg5[%c0_5, %c0_6] : memref<32x16xf32, #tpu.memory_space<vmem>>, vector<32x16xf32>
    %4 = arith.mulf %2, %3 : vector<32x16xf32>
    %5 = arith.mulf %0, %4 : vector<32x16xf32>
    %6 = arith.mulf %1, %4 : vector<32x16xf32>
    %7 = arith.mulf %5, %1 : vector<32x16xf32>
    %c0_i32 = arith.constant 0 : i32
    %8 = arith.cmpi eq, %arg1, %c0_i32 : i32
    %9 = arith.extui %8 : i1 to i32
    %c0_i32_7 = arith.constant 0 : i32
    %10 = arith.cmpi ne, %9, %c0_i32_7 : i32
    scf.if %10 {
      %cst_22 = arith.constant 0.000000e+00 : f32
      %26 = vector.broadcast %cst_22 : f32 to vector<8x16xf32>
      %c0_23 = arith.constant 0 : index
      %c0_24 = arith.constant 0 : index
      %27 = vector.load %arg6[%c0_23, %c0_24] : memref<8x16xf32, #tpu.memory_space<vmem>>, vector<8x16xf32>
      tpu.vector_store %arg6[%c0_23, %c0_24], %26 {strides = array<i32>} : memref<8x16xf32, #tpu.memory_space<vmem>>, vector<8x16xf32>,
      %cst_25 = arith.constant 0.000000e+00 : f32
      %28 = vector.broadcast %cst_25 : f32 to vector<8x16xf32>
      %c0_26 = arith.constant 0 : index
      %c0_27 = arith.constant 0 : index
      %29 = vector.load %arg7[%c0_26, %c0_27] : memref<8x16xf32, #tpu.memory_space<vmem>>, vector<8x16xf32>
      tpu.vector_store %arg7[%c0_26, %c0_27], %28 {strides = array<i32>} : memref<8x16xf32, #tpu.memory_space<vmem>>, vector<8x16xf32>,
      %cst_28 = arith.constant 0.000000e+00 : f32
      %30 = vector.broadcast %cst_28 : f32 to vector<8x16xf32>
      %c0_29 = arith.constant 0 : index
      %c0_30 = arith.constant 0 : index
      %31 = vector.load %arg8[%c0_29, %c0_30] : memref<8x16xf32, #tpu.memory_space<vmem>>, vector<8x16xf32>
      tpu.vector_store %arg8[%c0_29, %c0_30], %30 {strides = array<i32>} : memref<8x16xf32, #tpu.memory_space<vmem>>, vector<8x16xf32>,
    } else {
    }
    %c0_8 = arith.constant 0 : index
    %c0_9 = arith.constant 0 : index
    %11 = vector.load %arg6[%c0_8, %c0_9] : memref<8x16xf32, #tpu.memory_space<vmem>>, vector<8x16xf32>
    %12 = vector.shape_cast %7 : vector<32x16xf32> to vector<4x8x16xf32>
    %cst = arith.constant dense<0.000000e+00> : vector<8x16xf32>
    %13 = vector.multi_reduction <add>, %12, %cst [0] : vector<4x8x16xf32> to vector<8x16xf32>
    %14 = arith.addf %11, %13 : vector<8x16xf32>
    %c0_10 = arith.constant 0 : index
    %c0_11 = arith.constant 0 : index
    %15 = vector.load %arg6[%c0_10, %c0_11] : memref<8x16xf32, #tpu.memory_space<vmem>>, vector<8x16xf32>
    tpu.vector_store %arg6[%c0_10, %c0_11], %14 {strides = array<i32>} : memref<8x16xf32, #tpu.memory_space<vmem>>, vector<8x16xf32>,
    %c0_12 = arith.constant 0 : index
    %c0_13 = arith.constant 0 : index
    %16 = vector.load %arg7[%c0_12, %c0_13] : memref<8x16xf32, #tpu.memory_space<vmem>>, vector<8x16xf32>
    %17 = vector.shape_cast %5 : vector<32x16xf32> to vector<4x8x16xf32>
    %cst_14 = arith.constant dense<0.000000e+00> : vector<8x16xf32>
    %18 = vector.multi_reduction <add>, %17, %cst_14 [0] : vector<4x8x16xf32> to vector<8x16xf32>
    %19 = arith.addf %16, %18 : vector<8x16xf32>
    %c0_15 = arith.constant 0 : index
    %c0_16 = arith.constant 0 : index
    %20 = vector.load %arg7[%c0_15, %c0_16] : memref<8x16xf32, #tpu.memory_space<vmem>>, vector<8x16xf32>
    tpu.vector_store %arg7[%c0_15, %c0_16], %19 {strides = array<i32>} : memref<8x16xf32, #tpu.memory_space<vmem>>, vector<8x16xf32>,
    %c0_17 = arith.constant 0 : index
    %c0_18 = arith.constant 0 : index
    %21 = vector.load %arg8[%c0_17, %c0_18] : memref<8x16xf32, #tpu.memory_space<vmem>>, vector<8x16xf32>
    %22 = vector.shape_cast %6 : vector<32x16xf32> to vector<4x8x16xf32>
    %cst_19 = arith.constant dense<0.000000e+00> : vector<8x16xf32>
    %23 = vector.multi_reduction <add>, %22, %cst_19 [0] : vector<4x8x16xf32> to vector<8x16xf32>
    %24 = arith.addf %21, %23 : vector<8x16xf32>
    %c0_20 = arith.constant 0 : index
    %c0_21 = arith.constant 0 : index
    %25 = vector.load %arg8[%c0_20, %c0_21] : memref<8x16xf32, #tpu.memory_space<vmem>>, vector<8x16xf32>
    tpu.vector_store %arg8[%c0_20, %c0_21], %24 {strides = array<i32>} : memref<8x16xf32, #tpu.memory_space<vmem>>, vector<8x16xf32>,
    return
  }
  func.func @transform_0(%arg0: i32, %arg1: i32) -> (i32, i32) {
    %c1_i32 = arith.constant 1 : i32
    %0 = arith.muli %arg0, %c1_i32 : i32
    %1 = arith.addi %0, %arg1 : i32
    %c0_i32 = arith.constant 0 : i32
    %2 = arith.minsi %1, %c0_i32 : i32
    %c0_i32_0 = arith.constant 0 : i32
    %c0_i32_1 = arith.constant 0 : i32
    return %2, %c0_i32_0 : i32, i32
  }
  func.func @transform_1(%arg0: i32, %arg1: i32) -> (i32, i32) {
    %c1_i32 = arith.constant 1 : i32
    %0 = arith.muli %arg0, %c1_i32 : i32
    %1 = arith.addi %0, %arg1 : i32
    %c0_i32 = arith.constant 0 : i32
    %2 = arith.minsi %1, %c0_i32 : i32
    %c0_i32_0 = arith.constant 0 : i32
    %c0_i32_1 = arith.constant 0 : i32
    return %2, %c0_i32_0 : i32, i32
  }
  func.func @transform_2(%arg0: i32, %arg1: i32) -> (i32, i32) {
    %c1_i32 = arith.constant 1 : i32
    %0 = arith.muli %arg0, %c1_i32 : i32
    %1 = arith.addi %0, %arg1 : i32
    %c0_i32 = arith.constant 0 : i32
    %2 = arith.minsi %1, %c0_i32 : i32
    %c0_i32_0 = arith.constant 0 : i32
    %c0_i32_1 = arith.constant 0 : i32
    return %2, %c0_i32_0 : i32, i32
  }
  func.func @transform_3(%arg0: i32, %arg1: i32) -> (i32, i32) {
    %c1_i32 = arith.constant 1 : i32
    %0 = arith.muli %arg0, %c1_i32 : i32
    %1 = arith.addi %0, %arg1 : i32
    %c0_i32 = arith.constant 0 : i32
    %2 = arith.minsi %1, %c0_i32 : i32
    %c0_i32_0 = arith.constant 0 : i32
    %c0_i32_1 = arith.constant 0 : i32
    return %2, %c0_i32_0 : i32, i32
  }
  func.func @transform_4(%arg0: i32, %arg1: i32) -> (i32, i32) {
    %c0_i32 = arith.constant 0 : i32
    %c0_i32_0 = arith.constant 0 : i32
    return %arg0, %c0_i32 : i32, i32
  }
  func.func @transform_5(%arg0: i32, %arg1: i32) -> (i32, i32) {
    %c0_i32 = arith.constant 0 : i32
    %c0_i32_0 = arith.constant 0 : i32
    return %arg0, %c0_i32 : i32, i32
  }
  func.func @transform_6(%arg0: i32, %arg1: i32) -> (i32, i32) {
    %c0_i32 = arith.constant 0 : i32
    %c0_i32_0 = arith.constant 0 : i32
    return %arg0, %c0_i32 : i32, i32
  }
}

</mosaic_0001>

<bundles_post_ra>
// kernel: dice_loss.1
= control target key start
LH: loop header
LB: loop body
LE: loop exit
PB: predicated region body
PF: predicated region fallthrough
CT: control target
= control target key end

     0   :  { %12 = vsyncpa [#allocation3], 0  ;;  %s413_s0 = inlined_call_operand.hbm [shape: f32[32,16], index: 0, kind: input, shape index: {}]   ;;  %s414_s1 = inlined_call_operand.hbm [shape: f32[32,16], index: 1, kind: input, shape index: {}]   ;;  %s415_s2 = inlined_call_operand.hbm [shape: f32[32,16], index: 2, kind: input, shape index: {}]   ;;  %s416_s3 = inlined_call_operand.hbm [shape: f32[32,16], index: 3, kind: input, shape index: {}]   ;;  %s417_s4 = inlined_call_operand.vmem [shape: f32[8,16], index: 4, kind: output, shape index: {0}]   ;;  %s418_s5 = inlined_call_operand.vmem [shape: f32[8,16], index: 5, kind: output, shape index: {1}]   ;;  %s419_s6 = inlined_call_operand.vmem [shape: f32[8,16], index: 6, kind: output, shape index: {2}]  }
   0x1   :  { %13 = vsyncpa [#allocation5], 0 }
   0x2   :  { %14 = vsyncpa [#allocation8], 0  ;;  %s302_s21 = smov [#allocation4]   ;;  %s303_s23 = smov [#allocation2]  }
   0x3   :  { %s44_s22 = sshll.u32 %s302_s21, 4  ;;  %s26_s24 = sshll.u32 %s303_s23, 4  ;;  %s45_s22 = int_to_ptr.vmem [resolvable:$true] %s44_s22  ;;  %s27_s24 = int_to_ptr.vmem [resolvable:$true] %s26_s24 }
   0x4   :  { %s224_s25 = scalar_lea.vmem %s45_s22, 512  ;;  %p229_p1 = scmp.lt.s32.totalorder %s45_s22, %s45_s22 }
   0x5   :  { %p225_p0 = scmp.ne.s32.totalorder %s45_s22, %s224_s25  ;;  %p230_p2 = scmp.lt.s32.totalorder %s224_s25, %s224_s25 }
   0x7   :  { %p231_p3 = por %p230_p2, %p229_p1 }
   0x9   :  { %p232_p4 = pnand %p231_p3, %p225_p0 }
   0xb   :  { %235 = shalt.err (!%p232_p4)
}
   0xc   :  { %s304_s26 = smov 128   ;;  %s305_s27 = smov 8  }
   0xd   :  { %50 = dma.hbm_to_vmem [thread:$0]  %s414_s1, 512, %s45_s22, [#allocation5], %s304_s26, %s304_s26, %s305_s27  }
   0xe   :  { %s244_s30 = scalar_lea.vmem %s27_s24, 512  ;;  %p249_p6 = scmp.lt.s32.totalorder %s27_s24, %s27_s24 }
   0xf   :  { %p245_p5 = scmp.ne.s32.totalorder %s27_s24, %s244_s30  ;;  %p250_p7 = scmp.lt.s32.totalorder %s244_s30, %s244_s30 }
  0x11   :  { %p251_p8 = por %p250_p7, %p249_p6 }
  0x13   :  { %p252_p9 = pnand %p251_p8, %p245_p5 }
  0x15   :  { %255 = shalt.err (!%p252_p9)
}
  0x16   :  { %32 = dma.hbm_to_vmem [thread:$0]  %s413_s0, 512, %s27_s24, [#allocation3], %s304_s26, %s304_s26, %s305_s27  }
  0x17   :  { %s306_s9 = smov [#allocation6]   ;;  %s307_s11 = smov [#allocation7]  }
  0x18   :  { %s62_s10 = sshll.u32 %s306_s9, 4  ;;  %s80_s12 = sshll.u32 %s307_s11, 4  ;;  %s63_s10 = int_to_ptr.vmem [resolvable:$true] %s62_s10  ;;  %s81_s12 = int_to_ptr.vmem [resolvable:$true] %s80_s12 }
  0x19   :  { %s264_s1 = scalar_lea.vmem %s63_s10, 512  ;;  %p269_p11 = scmp.lt.s32.totalorder %s63_s10, %s63_s10 }
  0x1a   :  { %p265_p10 = scmp.ne.s32.totalorder %s63_s10, %s264_s1  ;;  %p270_p12 = scmp.lt.s32.totalorder %s264_s1, %s264_s1 }
  0x1c   :  { %p271_p13 = por %p270_p12, %p269_p11 }
  0x1e   :  { %p272_p0 = pnand %p271_p13, %p265_p10 }
  0x20   :  { %275 = shalt.err (!%p272_p0)
}
  0x21   :  { %68 = dma.hbm_to_vmem [thread:$0]  %s415_s2, 512, %s63_s10, [#allocation5], %s304_s26, %s304_s26, %s305_s27  }
  0x22   :  { %s284_s0 = scalar_lea.vmem %s81_s12, 512  ;;  %p289_p2 = scmp.lt.s32.totalorder %s81_s12, %s81_s12 }
  0x23   :  { %p285_p1 = scmp.ne.s32.totalorder %s81_s12, %s284_s0  ;;  %p290_p3 = scmp.lt.s32.totalorder %s284_s0, %s284_s0 }
  0x25   :  { %p291_p4 = por %p290_p3, %p289_p2 }
  0x27   :  { %p292_p5 = pnand %p291_p4, %p285_p1 }
  0x29   :  { %295 = shalt.err (!%p292_p5)
}
  0x2a   :  { %86 = dma.hbm_to_vmem [thread:$0]  %s416_s3, 512, %s81_s12, [#allocation8], %s304_s26, %s304_s26, %s305_s27  }
  0x2b   :  { %296 = dma.done.wait [#allocation3], 512  }
  0x2c   :  { %297 = vsyncadd [#allocation3], 4294966784 }
  0x2d   :  { %298 = dma.done.wait [#allocation5], 1024  }
  0x2e   :  { %299 = vsyncadd [#allocation5], 4294966272 }
  0x2f   :  { %300 = dma.done.wait [#allocation8], 512  }
  0x30   :  { %301 = vsyncadd [#allocation8], 4294966784  ;;  %vm151_vm0 = vcmask 130048   ;;  %v308_v0 = vmov 0.0   ;;  %v115_v1 = vld [vmem:[#allocation2] sm:$0xff]  ;;  %v116_v2 = vld [vmem:[#allocation2 + $0x8] sm:$0xff] }
  0x31   :  { %152 = vst.msk [vmem:[%s417_s4] sm:$0xff] %vm151_vm0, %v308_v0  ;;  %153 = vst.msk [vmem:[%s418_s5] sm:$0xff] %vm151_vm0, %v308_v0  ;;  %v117_v3 = vld [vmem:[#allocation2 + $0x10] sm:$0xff]  ;;  %v123_v4 = vld [vmem:[#allocation6] sm:$0xff] }
  0x32   :  { %154 = vst.msk [vmem:[%s419_s6] sm:$0xff] %vm151_vm0, %v308_v0  ;;  %v118_v5 = vld [vmem:[#allocation2 + $0x18] sm:$0xff]  ;;  %v119_v6 = vld [vmem:[#allocation4] sm:$0xff]  ;;  %v124_v7 = vld [vmem:[#allocation6 + $0x8] sm:$0xff] }
  0x33   :  { %v125_v8 = vld [vmem:[#allocation6 + $0x10] sm:$0xff]  ;;  %v126_v9 = vld [vmem:[#allocation6 + $0x18] sm:$0xff]  ;;  %v127_v10 = vld [vmem:[#allocation7] sm:$0xff] }
  0x34   :  { %v128_v11 = vld [vmem:[#allocation7 + $0x8] sm:$0xff]  ;;  %v129_v12 = vld [vmem:[#allocation7 + $0x10] sm:$0xff]  ;;  %v130_v15 = vld [vmem:[#allocation7 + $0x18] sm:$0xff]  ;;  %v131_v16 = vmul.f32 %v127_v10, %v123_v4 }
  0x35   :  { %v120_v13 = vld [vmem:[#allocation4 + $0x8] sm:$0xff]  ;;  %v121_v14 = vld [vmem:[#allocation4 + $0x10] sm:$0xff]  ;;  %v132_v17 = vmul.f32 %v128_v11, %v124_v7  ;;  %v133_v18 = vmul.f32 %v129_v12, %v125_v8  ;;  %v134_v19 = vmul.f32 %v130_v15, %v126_v9  ;;  %v122_v20 = vld [vmem:[#allocation4 + $0x18] sm:$0xff] }
  0x36   :  { %v135_v21 = vmul.f32 %v131_v16, %v115_v1  ;;  %v139_v25 = vmul.f32 %v131_v16, %v119_v6 }
  0x37   :  { %v136_v22 = vmul.f32 %v132_v17, %v116_v2  ;;  %v137_v23 = vmul.f32 %v133_v18, %v117_v3  ;;  %v138_v24 = vmul.f32 %v134_v19, %v118_v5  ;;  %v140_v26 = vmul.f32 %v132_v17, %v120_v13 }
  0x38   :  { %v141_v27 = vmul.f32 %v133_v18, %v121_v14  ;;  %v143_v28 = vmul.f32 %v135_v21, %v119_v6  ;;  %v167_v31 = vsel %vm151_vm0, %v135_v21, 0.0  ;;  %v142_v35 = vmul.f32 %v134_v19, %v122_v20  ;;  %v166_v49 = vld [vmem:[%s418_s5] sm:$0xff] }
  0x39   :  { %v144_v29 = vmul.f32 %v136_v22, %v120_v13  ;;  %v145_v30 = vmul.f32 %v137_v23, %v121_v14  ;;  %v146_v32 = vmul.f32 %v138_v24, %v122_v20  ;;  %v168_v33 = vsel %vm151_vm0, %v136_v22, 0.0  ;;  %v155_v51 = vld [vmem:[%s417_s4] sm:$0xff] }
  0x3a   :  { %v170_v34 = vsel %vm151_vm0, %v137_v23, 0.0  ;;  %v157_v36 = vsel %vm151_vm0, %v143_v28, 0.0  ;;  %v169_v39 = vadd.f32 %v168_v33, %v167_v31  ;;  %v172_v41 = vsel %vm151_vm0, %v138_v24, 0.0  ;;  %v176_v55 = vld [vmem:[%s419_s6] sm:$0xff] }
  0x3b   :  { %v158_v37 = vsel %vm151_vm0, %v144_v29, 0.0  ;;  %v160_v38 = vsel %vm151_vm0, %v145_v30, 0.0  ;;  %v177_v42 = vsel %vm151_vm0, %v139_v25, 0.0  ;;  %v178_v43 = vsel %vm151_vm0, %v140_v26, 0.0 }
  0x3c   :  { %v159_v40 = vadd.f32 %v158_v37, %v157_v36  ;;  %v162_v44 = vsel %vm151_vm0, %v146_v32, 0.0  ;;  %v171_v45 = vadd.f32 %v170_v34, %v169_v39  ;;  %v179_v46 = vadd.f32 %v178_v43, %v177_v42 }
  0x3d   :  { %v180_v47 = vsel %vm151_vm0, %v141_v27, 0.0  ;;  %v182_v50 = vsel %vm151_vm0, %v142_v35, 0.0 }
  0x3e   :  { %v161_v48 = vadd.f32 %v160_v38, %v159_v40  ;;  %v173_v52 = vadd.f32 %v172_v41, %v171_v45  ;;  %v181_v53 = vadd.f32 %v180_v47, %v179_v46 }
  0x40   :  { %v163_v54 = vadd.f32 %v162_v44, %v161_v48  ;;  %v174_v56 = vadd.f32 %v173_v52, %v166_v49  ;;  %v183_v57 = vadd.f32 %v182_v50, %v181_v53 }
  0x42   :  { %v164_v58 = vadd.f32 %v163_v54, %v155_v51  ;;  %175 = vst.msk [vmem:[%s418_s5] sm:$0xff] %vm151_vm0, %v174_v56  ;;  %v184_v59 = vadd.f32 %v183_v57, %v176_v55 }
  0x44   :  { %165 = vst.msk [vmem:[%s417_s4] sm:$0xff] %vm151_vm0, %v164_v58  ;;  %185 = vst.msk [vmem:[%s419_s6] sm:$0xff] %vm151_vm0, %v184_v59 }
  0x45   :  { %198 = vsyncpa [#allocation3], 1 }
  0x46   :  { %199 = vsyncpa [#allocation5], 1 }
  0x47   :  { %200 = vsyncpa [#allocation8], 1 }

</bundles_post_ra>
